<compile_context>
chip_gen: v7x
topology: tpu7x:2x2x1
jax: 0.10.0
libtpu: 0.0.40
codegen_flags: <defaults>
</compile_context>

<pallas_src>
import functools

import jax
import jax.numpy as jnp
from jax.experimental import pallas as pl
from jax.experimental.pallas import tpu as pltpu

F_PAD = 128  # lane-dense feature width; all hiddens in this model are <= 128


def _round_up(n, m):
    return ((n + m - 1) // m) * m


def _dimension_semantics():
    """Real dual-TC sharding on v7x; plain 'parallel' elsewhere (1 TC/chip)."""
    try:
        kind = jax.devices()[0].device_kind.lower()
    except Exception:  # pragma: no cover - defensive
        kind = ""
    if "v7" in kind:
        return (pltpu.CORE_PARALLEL,)
    return ("parallel",)


def _fused_mlp_kernel(x_ref, w_ref, b_ref, o_ref, *, blocks):
    """All Linear(+bias)+ReLU(+soft-residual) blocks fused in one grid step.

    blocks: tuple of (k_i, n_i, residual_i) — true fan-in, (possibly padded)
    fan-out and residual flag per layer. Intermediates live in vregs/VMEM.
    """
    h = x_ref[...].astype(jnp.float32)                       # (tb, f_in) f32
    for i, (k, n, residual) in enumerate(blocks):             # static unroll
        y = jnp.dot(h.astype(jnp.bfloat16),                   # bf16 MXU, f32 acc
                    w_ref[i, :k, :n],
                    preferred_element_type=jnp.float32)
        y = y + b_ref[i, 0, :n]                                # f32 bias broadcast
        y = jnp.maximum(y, 0.0)                                # ReLU (f32 VPU)
        if residual:                                           # ResidualWrapper
            if h.shape[1] != y.shape[1]:                       # only if last block
                h = jnp.pad(h, ((0, 0), (0, y.shape[1] - h.shape[1])))
            y = y + h
        h = y
    o_ref[...] = h.astype(o_ref.dtype)                         # bf16, 128 lanes


def pack_params(params, hiddens):
    """Pack per-layer (W, b) into lane-dense stacks. Call ONCE at init."""
    n_blocks = len(hiddens) - 1
    w_pack = jnp.zeros((n_blocks, F_PAD, F_PAD), jnp.float32)
    b_pack = jnp.zeros((n_blocks, 1, F_PAD), jnp.float32)
    for i, (w, b) in enumerate(params):
        fi, fo = w.shape
        w_pack = w_pack.at[i, :fi, :fo].set(w)
        b_pack = b_pack.at[i, 0, :fo].set(b)
    return w_pack.astype(jnp.bfloat16), b_pack  # bf16 MXU-native weights, f32 bias


def sequential_net_forward(x, w_pack, b_pack, hiddens, *,
                           tb_target=2048, out_dtype=jnp.float32):
    """Fused forward pass of SequentialNet(hiddens, residual='soft', ReLU)."""
    batch, f_in = x.shape
    assert f_in == hiddens[0]
    assert max(hiddens) <= F_PAD, "this kernel assumes all hiddens <= 128"
    n_blocks = len(hiddens) - 1

    # Static per-layer (K, N, residual). Last block keeps N=F_PAD so the final
    # store is a full 128-lane unmasked vst (its padded weight cols are zero).
    blocks = []
    for i, (fi, fo) in enumerate(zip(hiddens[:-1], hiddens[1:])):
        n = F_PAD if i == n_blocks - 1 else fo
        blocks.append((fi, n, fi == fo))
    blocks = tuple(blocks)

    # Batch tiling: tb multiple of 8 sublanes; ragged last block handled by
    # Pallas (OOB rows read but never written — row-wise math, so safe).
    tb = max(8, min(_round_up(tb_target, 8), _round_up(batch, 8)))
    grid = (pl.cdiv(batch, tb),)

    kernel = functools.partial(_fused_mlp_kernel, blocks=blocks)
    out = pl.pallas_call(
        kernel,
        out_shape=jax.ShapeDtypeStruct((batch, F_PAD), jnp.bfloat16),
        grid_spec=pltpu.PrefetchScalarGridSpec(
            num_scalar_prefetch=0,
            grid=grid,
            in_specs=[
                # Unpadded x tile: last dim f_in equals the full array dim.
                pl.BlockSpec((tb, f_in), lambda i: (i, 0)),
                # Weight / bias stacks: constant index map => fetched once,
                # stay VMEM-resident across every batch tile.
                pl.BlockSpec((n_blocks, F_PAD, F_PAD), lambda i: (0, 0, 0)),
                pl.BlockSpec((n_blocks, 1, F_PAD), lambda i: (0, 0, 0)),
            ],
            out_specs=pl.BlockSpec((tb, F_PAD), lambda i: (i, 0)),
        ),
        compiler_params=pltpu.CompilerParams(
            dimension_semantics=_dimension_semantics(),
        ),
    )(x, w_pack, b_pack)

    return out[:, :hiddens[-1]].astype(out_dtype)


def init_params(key, hiddens):
    """Deterministic synthetic parameters (Kaiming-style scaling for ReLU)."""
    params = []
    for i, (f_in, f_out) in enumerate(zip(hiddens[:-1], hiddens[1:])):
        kw, kb = jax.random.split(jax.random.fold_in(key, i))
        scale = jnp.sqrt(2.0 / f_in)
        w = scale * jax.random.normal(kw, (f_in, f_out), dtype=jnp.float32)
        b = 0.01 * jax.random.normal(kb, (f_out,), dtype=jnp.float32)
        params.append((w, b))
    return params


def reference_forward(x, params, hiddens, *, matmul_dtype=jnp.float32):
    """Plain-JAX reference of the same forward pass."""
    for i, (f_in, f_out) in enumerate(zip(hiddens[:-1], hiddens[1:])):
        w, b = params[i]
        y = jnp.dot(x.astype(matmul_dtype), w.astype(matmul_dtype),
                    preferred_element_type=jnp.float32) + b
        y = jnp.maximum(y, 0.0)
        x = x + y if f_in == f_out else y
    return x


if __name__ == "__main__":
    hiddens = [32, 64, 64, 16]
    batch = 20  # with tb_target=8: 3 batch tiles, the last one ragged (rows 16..19)

    key = jax.random.PRNGKey(0)
    kx, kp = jax.random.split(key)
    x = jax.random.normal(kx, (batch, hiddens[0]), dtype=jnp.float32)
    params = init_params(kp, hiddens)

    # Packing is hoisted out of the forward path: done once here.
    w_pack, b_pack = pack_params(params, hiddens)

    out = sequential_net_forward(x, w_pack, b_pack, hiddens, tb_target=8)
    out = jax.block_until_ready(out)
    assert out.shape == (batch, hiddens[-1])

    # Kernel matmuls are bf16 (f32 accumulate) and the store rounds to bf16,
    # so check tightly against a bf16-matmul reference and loosely vs full f32.
    ref_bf16 = reference_forward(x, params, hiddens, matmul_dtype=jnp.bfloat16)
    ref_f32 = reference_forward(x, params, hiddens, matmul_dtype=jnp.float32)
    assert jnp.allclose(out, ref_bf16, atol=1e-2, rtol=1e-2)
    assert jnp.allclose(out, ref_f32, atol=5e-2, rtol=5e-2)

    print("KERNEL_OK")
</pallas_src>

<mosaic_0001>
module attributes {stable_mosaic.version = 11 : i64} {
  func.func @_fused_mlp_kernel(%arg0: i32, %arg1: memref<8x32xf32, #tpu.memory_space<vmem>>, %arg2: memref<3x128x128xbf16, #tpu.memory_space<vmem>>, %arg3: memref<3x1x128xf32, #tpu.memory_space<vmem>>, %arg4: memref<8x128xbf16, #tpu.memory_space<vmem>>) attributes {dimension_semantics = [#tpu.dimension_semantics<parallel>], iteration_bounds = array<i64: 3>, scalar_prefetch = 0 : i64, scratch_operands = 0 : i64, tpu.core_type = #tpu.core_type<tc>, window_params = [{transform_indices = @transform_0, window_bounds = array<i64: 8, 32>}, {pipeline_mode = #tpu.pipeline_mode<synchronous>, transform_indices = @transform_1, window_bounds = array<i64: 3, 128, 128>}, {pipeline_mode = #tpu.pipeline_mode<synchronous>, transform_indices = @transform_2, window_bounds = array<i64: 3, 1, 128>}, {transform_indices = @transform_3, window_bounds = array<i64: 8, 128>}]} {
    %c0 = arith.constant 0 : index
    %c0_0 = arith.constant 0 : index
    %0 = vector.load %arg1[%c0, %c0_0] : memref<8x32xf32, #tpu.memory_space<vmem>>, vector<8x32xf32>
    %1 = arith.truncf %0 : vector<8x32xf32> to vector<8x32xbf16>
    %c0_1 = arith.constant 0 : index
    %c0_2 = arith.constant 0 : index
    %c0_3 = arith.constant 0 : index
    %2 = vector.load %arg2[%c0_1, %c0_2, %c0_3] : memref<3x128x128xbf16, #tpu.memory_space<vmem>>, vector<1x32x64xbf16>
    %3 = vector.shape_cast %2 : vector<1x32x64xbf16> to vector<32x64xbf16>
    %cst = arith.constant dense<0.000000e+00> : vector<8x64xf32>
    %4 = tpu.matmul %1, %3, %cst {dimension_numbers = #tpu.dot_dimension_numbers<[1], [0], [0], [1], [0, 0, 1, 1], [], []>} : vector<8x32xbf16>, vector<32x64xbf16>, vector<8x64xf32> -> vector<8x64xf32>
    %c0_4 = arith.constant 0 : index
    %c0_5 = arith.constant 0 : index
    %c0_6 = arith.constant 0 : index
    %5 = vector.load %arg3[%c0_4, %c0_5, %c0_6] : memref<3x1x128xf32, #tpu.memory_space<vmem>>, vector<1x1x64xf32>
    %6 = vector.shape_cast %5 : vector<1x1x64xf32> to vector<64xf32>
    %7 = vector.shape_cast %6 : vector<64xf32> to vector<1x64xf32>
    %8 = vector.broadcast %7 : vector<1x64xf32> to vector<8x64xf32>
    %9 = arith.addf %4, %8 : vector<8x64xf32>
    %cst_7 = arith.constant 0.000000e+00 : f32
    %10 = vector.broadcast %cst_7 : f32 to vector<8x64xf32>
    %11 = arith.maximumf %9, %10 : vector<8x64xf32>
    %12 = arith.truncf %11 : vector<8x64xf32> to vector<8x64xbf16>
    %c1 = arith.constant 1 : index
    %c0_8 = arith.constant 0 : index
    %c0_9 = arith.constant 0 : index
    %13 = vector.load %arg2[%c1, %c0_8, %c0_9] : memref<3x128x128xbf16, #tpu.memory_space<vmem>>, vector<1x64x64xbf16>
    %14 = vector.shape_cast %13 : vector<1x64x64xbf16> to vector<64x64xbf16>
    %cst_10 = arith.constant dense<0.000000e+00> : vector<8x64xf32>
    %15 = tpu.matmul %12, %14, %cst_10 {dimension_numbers = #tpu.dot_dimension_numbers<[1], [0], [0], [1], [0, 0, 1, 1], [], []>} : vector<8x64xbf16>, vector<64x64xbf16>, vector<8x64xf32> -> vector<8x64xf32>
    %c1_11 = arith.constant 1 : index
    %c0_12 = arith.constant 0 : index
    %c0_13 = arith.constant 0 : index
    %16 = vector.load %arg3[%c1_11, %c0_12, %c0_13] : memref<3x1x128xf32, #tpu.memory_space<vmem>>, vector<1x1x64xf32>
    %17 = vector.shape_cast %16 : vector<1x1x64xf32> to vector<64xf32>
    %18 = vector.shape_cast %17 : vector<64xf32> to vector<1x64xf32>
    %19 = vector.broadcast %18 : vector<1x64xf32> to vector<8x64xf32>
    %20 = arith.addf %15, %19 : vector<8x64xf32>
    %cst_14 = arith.constant 0.000000e+00 : f32
    %21 = vector.broadcast %cst_14 : f32 to vector<8x64xf32>
    %22 = arith.maximumf %20, %21 : vector<8x64xf32>
    %23 = arith.addf %22, %11 : vector<8x64xf32>
    %24 = arith.truncf %23 : vector<8x64xf32> to vector<8x64xbf16>
    %c2 = arith.constant 2 : index
    %c0_15 = arith.constant 0 : index
    %c0_16 = arith.constant 0 : index
    %25 = vector.load %arg2[%c2, %c0_15, %c0_16] : memref<3x128x128xbf16, #tpu.memory_space<vmem>>, vector<1x64x128xbf16>
    %26 = vector.shape_cast %25 : vector<1x64x128xbf16> to vector<64x128xbf16>
    %cst_17 = arith.constant dense<0.000000e+00> : vector<8x128xf32>
    %27 = tpu.matmul %24, %26, %cst_17 {dimension_numbers = #tpu.dot_dimension_numbers<[1], [0], [0], [1], [0, 0, 1, 1], [], []>} : vector<8x64xbf16>, vector<64x128xbf16>, vector<8x128xf32> -> vector<8x128xf32>
    %c2_18 = arith.constant 2 : index
    %c0_19 = arith.constant 0 : index
    %c0_20 = arith.constant 0 : index
    %28 = vector.load %arg3[%c2_18, %c0_19, %c0_20] : memref<3x1x128xf32, #tpu.memory_space<vmem>>, vector<1x1x128xf32>
    %29 = vector.shape_cast %28 : vector<1x1x128xf32> to vector<128xf32>
    %30 = vector.shape_cast %29 : vector<128xf32> to vector<1x128xf32>
    %31 = vector.broadcast %30 : vector<1x128xf32> to vector<8x128xf32>
    %32 = arith.addf %27, %31 : vector<8x128xf32>
    %cst_21 = arith.constant 0.000000e+00 : f32
    %33 = vector.broadcast %cst_21 : f32 to vector<8x128xf32>
    %34 = arith.maximumf %32, %33 : vector<8x128xf32>
    %35 = arith.truncf %34 : vector<8x128xf32> to vector<8x128xbf16>
    %c0_22 = arith.constant 0 : index
    %c0_23 = arith.constant 0 : index
    %36 = vector.load %arg4[%c0_22, %c0_23] : memref<8x128xbf16, #tpu.memory_space<vmem>>, vector<8x128xbf16>
    tpu.vector_store %arg4[%c0_22, %c0_23], %35 {strides = array<i32>} : memref<8x128xbf16, #tpu.memory_space<vmem>>, vector<8x128xbf16>,
    return
  }
  func.func @transform_0(%arg0: i32) -> (i32, i32) {
    %c0_i32 = arith.constant 0 : i32
    %c0_i32_0 = arith.constant 0 : i32
    return %arg0, %c0_i32 : i32, i32
  }
  func.func @transform_1(%arg0: i32) -> (i32, i32, i32) {
    %c0_i32 = arith.constant 0 : i32
    %c0_i32_0 = arith.constant 0 : i32
    %c0_i32_1 = arith.constant 0 : i32
    %c0_i32_2 = arith.constant 0 : i32
    return %c0_i32, %c0_i32_0, %c0_i32_1 : i32, i32, i32
  }
  func.func @transform_2(%arg0: i32) -> (i32, i32, i32) {
    %c0_i32 = arith.constant 0 : i32
    %c0_i32_0 = arith.constant 0 : i32
    %c0_i32_1 = arith.constant 0 : i32
    %c0_i32_2 = arith.constant 0 : i32
    return %c0_i32, %c0_i32_0, %c0_i32_1 : i32, i32, i32
  }
  func.func @transform_3(%arg0: i32) -> (i32, i32) {
    %c0_i32 = arith.constant 0 : i32
    %c0_i32_0 = arith.constant 0 : i32
    return %arg0, %c0_i32 : i32, i32
  }
}

</mosaic_0001>

<bundles_post_ra>
// kernel: tpu_custom_call.1
= control target key start
LH: loop header
LB: loop body
LE: loop exit
PB: predicated region body
PF: predicated region fallthrough
CT: control target
= control target key end

     0   :  { %8 = vsyncpa [#allocation3], 0  ;;  %s1049_s0 = inlined_call_operand.hbm [shape: f32[20,32], index: 0, kind: input, shape index: {}]   ;;  %s1050_s1 = inlined_call_operand.hbm [shape: bf16[3,128,128], index: 1, kind: input, shape index: {}]   ;;  %s1051_s2 = inlined_call_operand.vmem [shape: f32[3,1,128], index: 2, kind: input, shape index: {}]   ;;  %s1052_s3 = inlined_call_operand.hbm [shape: bf16[20,128], index: 3, kind: output, shape index: {}]  }
   0x1   :  { %10 = vsyncpa [#allocation3 + $0x1], 0 }
   0x2   :  { %11 = vsyncpa [#allocation6], 0 }
   0x3   :  { %12 = vsyncpa [#allocation4], 0 }
   0x4   :  { %14 = vsyncpa [#allocation4 + $0x1], 0  ;;  %s847_s12 = smov 0   ;;  %s849_s13 = smov 0  }
   0x5   :  { %s851_s14 = smov 0   ;;  %s853_s15 = smov 0  }
   0x6 LB: > { %s868_s16 = sadd.s32 4294967295, %s818_s15   ;;  %s542_s17 = sadd.s32 4294967294, %s818_s15   ;;  %s818_s15 = sphi %s853_s15, %s1071_s15   ;;  %s814_s14 = sphi %s851_s14, %s1070_s14   ;;  %s810_s13 = sphi %s849_s13, %s1069_s13   ;;  %s806_s12 = sphi %s847_s12, %s1068_s12  }
   0x7   : > { %p40_p0 = scmp.ne.s32.totalorder %s810_s13, %s806_s12  ;;  %p1053_p1 = scmp.eq.s32.totalorder %s868_s16, 0 }
   0x8   : > { %p112_p3 = scmp.eq.s32.totalorder %s542_s17, 2  ;;  %p543_p5 = scmp.ge.s32.totalorder %s818_s15, 1 }
   0x9   : > { %p877_p4 = por %p1053_p1, %p40_p0  ;;  %p119_p7 = scmp.lt.s32.totalorder %s818_s15, 4 }
   0xa   : > { %p882_p6 = por %p112_p3, %p40_p0  ;;  %s820_s21 = smov [#allocation5]  }
   0xb   : > { %s1056_s18 = scalar_select %p877_p4, 1, 0 }
   0xc   : > { %s1057_s19 = scalar_select %p882_p6, 1, 0 }
   0xd   : > { %p887_p8 = pnand %p543_p5, %p119_p7  ;;  %s131_s22 = sshll.u32 %s820_s21, 4  ;;  %s132_s22 = int_to_ptr.vmem [resolvable:$true] %s131_s22 }
   0xe   : > { %s900_s24 = sadd.s32 1, %s818_s15   ;;  %s27_s25 = sadd.s32 1, %s814_s14 }
   0xf   : > { %s1058_s20 = scalar_select %p887_p8, 1, 0 }
  0x10   : > { %p627_p9 = pneg %p887_p8  ;;  %s24_s26 = ssub.s32 %s818_s15, %s900_s24 }
  0x11   : > { %s690_s29 = scalar_lea.hbm %s1050_s1, 3072 }
  0x12   : > { %p895_p10 = pnand %p627_p9, %p1053_p1  ;;  %p691_p11 = scmp.ne.s32.totalorder %s1050_s1, %s690_s29 }
  0x13   : > { %p697_p3 = scmp.lt.u32.totalorder %s690_s29, %s1050_s1 }
  0x14   : > { %p692_p12 = pneg %p895_p10 }
  0x16   : > { %p693_p13 = pnand %p692_p12, %p691_p11 }
  0x18   : > { %p694_p0 = pneg %p693_p13 }
  0x1a   : > { %p699_p5 = pnand %p697_p3, %p694_p0 }
  0x1c   : > { %702 = shalt.err (!%p699_p5)
}
  0x1d   : > { %s703_s7 = scalar_lea.vmem %s132_s22, 3072  ;;  %p711_p2 = scmp.lt.s32.totalorder %s132_s22, %s132_s22 }
  0x1e   : > { %p704_p7 = scmp.ne.s32.totalorder %s132_s22, %s703_s7  ;;  %p712_p6 = scmp.lt.s32.totalorder %s703_s7, %s703_s7 }
  0x20   : > { %p706_p9 = pnand %p704_p7, %p692_p12  ;;  %p713_p4 = por %p712_p6, %p711_p2 }
  0x22   : > { %p707_p1 = pneg %p706_p9 }
  0x24   : > { %p714_p8 = pnand %p713_p4, %p707_p1 }
  0x26   : > { %717 = shalt.err (!%p714_p8)
}
  0x27   : > { %s821_s8 = smov 64   ;;  %s822_s9 = smov 4  }
  0x28   : > { %630 = dma.hbm_to_vmem [thread:$0]  (!%p895_p10), %s1050_s1, 3072, %s132_s22, [#allocation6], %s821_s8, %s821_s8, %s822_s9  }
  0x29   : > { %p25_p11 = scmp.eq.s32.totalorder %s24_s26, 0  ;;  %p34_p2 = scmp.ne.s32.totalorder %s814_s14, %s810_s13 }
  0x2a   : > { %p35_p1 = scmp.eq.s32.totalorder %s818_s15, 0  ;;  %p640_p4 = scmp.lt.s32.totalorder %s818_s15, 3 }
  0x2b   : > { %s926_s17 = scalar_select %p25_p11, %s814_s14, %s27_s25  }
  0x2c   : > { %p36_p6 = por %p35_p1, %p34_p2  ;;  %p1060_p8 = scmp.eq.s32.totalorder %s868_s16, 2 }
  0x2d   : > { %s148_s27 = sand.u32 1, %s814_s14   ;;  %s547_s28 = sshll.u32 %s818_s15, 7 }
  0x2e   : > { %p930_p12 = por %p1060_p8, %p34_p2  ;;  %s546_s29 = sshll.u32 %s148_s27, 3 }
  0x2f   : > { %s939_s4 = scalar_lea.hbm %s1049_s0, %s547_s28  ;;  %s152_s22 = scalar_lea.vmem [#allocation2], %s546_s29 }
  0x30   : > { %s159_s25 = sshll.u32 %s152_s22, 4  ;;  %p941_p10 = pnand %p640_p4, %p36_p6  ;;  %s945_s25 = int_to_ptr.vmem [resolvable:$true] %s159_s25 }
  0x31   : > { %s149_s5 = scalar_lea.sflag [#allocation3], %s148_s27  ;;  %s718_s6 = scalar_lea.hbm %s939_s4, 128 }
  0x32   : > { %p719_p13 = scmp.ne.s32.totalorder %s939_s4, %s718_s6  ;;  %p720_p0 = pneg %p941_p10 }
  0x33   : > { %s723_s9 = scalar_lea.hbm %s1049_s0, 384  ;;  %p724_p7 = scmp.lt.u32.totalorder %s939_s4, %s1049_s0 }
  0x34   : > { %p721_p3 = pnand %p720_p0, %p719_p13  ;;  %p725_p9 = scmp.lt.u32.totalorder %s723_s9, %s718_s6 }
  0x35   : > { %p727_p2 = scmp.lt.u32.totalorder %s718_s6, %s939_s4 }
  0x36   : > { %p722_p5 = pneg %p721_p3  ;;  %p726_p11 = por %p725_p9, %p724_p7 }
  0x38   : > { %p728_p1 = por %p727_p2, %p726_p11 }
  0x3a   : > { %p729_p4 = pnand %p728_p1, %p722_p5 }
  0x3c   : > { %732 = shalt.err (!%p729_p4)
}
  0x3d   : > { %s733_s27 = scalar_lea.vmem %s945_s25, 128  ;;  %s823_s28 = smov [#allocation2]  }
  0x3e   : > { %p734_p6 = scmp.ne.s32.totalorder %s945_s25, %s733_s27  ;;  %s738_s29 = sshll.u32 %s823_s28, 4  ;;  %s739_s29 = int_to_ptr.vmem [resolvable:$false] %s738_s29 }
  0x3f   : > { %s740_s23 = scalar_lea.vmem %s739_s29, 256  ;;  %p741_p3 = scmp.lt.s32.totalorder %s945_s25, %s739_s29 }
  0x40   : > { %p736_p8 = pnand %p734_p6, %p720_p0  ;;  %p742_p7 = scmp.lt.s32.totalorder %s740_s23, %s733_s27 }
  0x42   : > { %p737_p13 = pneg %p736_p8  ;;  %p743_p9 = por %p742_p7, %p741_p3 }
  0x44   : > { %p744_p11 = pnand %p743_p9, %p737_p13 }
  0x46   : > { %747 = shalt.err (!%p744_p11)
}
  0x47   : > { %634 = dma.hbm_to_vmem [thread:$0]  (!%p941_p10), %s939_s4, 128, %s945_s25, %s149_s5  }
  0x48   : > { %p1063_p5 = scmp.ne.s32.totalorder %s1058_s20, 0 }
  0x49   : > { %s975_s30 = sand.u32 (!%p1063_p5), 1, %s810_s13   ;;  %p1064_p0 = scmp.ne.s32.totalorder (!%p1063_p5), %s1056_s18, 0 }
  0x4a   : > { %168 = sbr.rel (%p1063_p5) target bundleno = 765 (0x2fd), region = 32  ;;  %s549_s22 = sshll.u32 (!%p1063_p5), %s975_s30, 3 }
  0x4b   : > { %s171_s6 = scalar_lea.sflag (!%p1063_p5), [#allocation3], %s975_s30  ;;  %s174_s7 = scalar_lea.vmem (!%p1063_p5), [#allocation2], %s549_s22 }
  0x51   : > { %793 = dma.done.wait (%p1064_p0), %s171_s6, 128  }
  0x52   : > { %795 = vsyncadd (%p1064_p0), %s171_s6, 4294967168  ;;  %p1065_p2 = scmp.eq.s32.totalorder %s868_s16, 0 }
  0x54   : > { %797 = dma.done.wait (%p1065_p2), [#allocation6], 3072   ;;  %p1066_p10 = pmov %p1065_p2 }
  0x55   : > { %v824_v0 = vmov 0.0   ;;  %vm825_vm0 = vmmov 0   ;;  %v680_v1 = vld [vmem:[#allocation5] sm:$0xff]   ;;  %v681_v2 = vld [vmem:[#allocation5 + $0x8] sm:$0xff]   ;;  %v202_v3 = vld [vmem:[%s174_s7] sm:$0xff]  ;;  %vm227_vm1 = vcmask 261120  }
  0x56   : > { %799 = vsyncadd (%p1066_p10), [#allocation6], 4294964224  ;;  %587 = vmatprep.subr.bf16.mxu0 %v824_v0  ;;  %591 = vmatprep.mubr.msk.bf16.mxu0 %vm825_vm0, %v824_v0  ;;  %v682_v4 = vld [vmem:[#allocation5 + $0x40] sm:$0xff]   ;;  %v683_v5 = vld [vmem:[#allocation5 + $0x48] sm:$0xff]   ;;  %v203_v6 = vpack.c.bf16 %v202_v3, %v202_v3  ;;  %vm314_vm2 = vcmask 523264   ;;  %s551_s26 = sshll.u32 %s975_s30, 2 }
  0x57   : > { %595 = vmatprep.subr.bf16.mxu1 %v824_v0  ;;  %603 = vmatprep.mubr.msk.bf16.mxu1 %vm825_vm0, %v824_v0  ;;  %v684_v7 = vld [vmem:[#allocation5 + $0x50] sm:$0xff]   ;;  %v685_v8 = vld [vmem:[#allocation5 + $0x58] sm:$0xff]   ;;  %v686_v9 = vld [vmem:[#allocation5 + $0x80] sm:$0xff]   ;;  %s571_s9 = sshll.u32 %s868_s16, 6  ;;  %s200_s10 = scalar_lea.vmem [#allocation7], %s551_s26 }
  0x58   : > { %588 = vmatpush3.bf16.msra.mxu0 %v680_v1  ;;  %596 = vmatpush3.bf16.msra.mxu1 %v682_v4  ;;  %v687_v10 = vld [vmem:[#allocation5 + $0x88] sm:$0xff]   ;;  %v552_v11 = vld [vmem:[%s1051_s2] ss:$0 sm:$0xff]  ;;  %v689_v20 = vld [vmem:[#allocation5 + $0x98] sm:$0xff]   ;;  %s462_s11 = sshll.u32 %s200_s10, 4  ;;  %s1006_s29 = scalar_lea.hbm %s1052_s3, %s571_s9  ;;  %s1008_s11 = int_to_ptr.vmem [resolvable:$true] %s462_s11 }
  0x59   : > { %589 = vmatprep.subr.bf16.mxu0 %v824_v0  ;;  %597 = vmatprep.subr.bf16.mxu1 %v824_v0  ;;  %v688_v19 = vld [vmem:[#allocation5 + $0x90] sm:$0xff]   ;;  %s449_s23 = scalar_lea.sflag [#allocation4], %s975_s30  ;;  %s748_s22 = scalar_lea.vmem %s1008_s11, 64 }
  0x5a   : > { %v557_v21 = vld [vmem:[%s1051_s2 + $0x1] ss:$0 sm:$0xff]  ;;  %v564_v30 = vld [vmem:[%s1051_s2 + $0x2] ss:$0 sm:$0xff]  ;;  %p749_p1 = scmp.ne.s32.totalorder %s1008_s11, %s748_s22  ;;  %s826_s16 = smov [#allocation7]  }
  0x5b   : > { %s752_s6 = sshll.u32 %s826_s16, 4  ;;  %s753_s6 = int_to_ptr.vmem [resolvable:$false] %s752_s6 }
  0x5c   : > { %590 = vmatpush3.bf16.msra.mxu0 %v681_v2  ;;  %598 = vmatpush3.bf16.msra.mxu1 %v683_v5  ;;  %p750_p4 = pnand %p749_p1, %p930_p12  ;;  %s754_s7 = scalar_lea.vmem %s753_s6, 128 }
  0x5d   : > { %607 = vmatprep.subr.bf16.mxu0 %v824_v0  ;;  %599 = vmatprep.subr.bf16.mxu1 %v824_v0  ;;  %p755_p8 = scmp.lt.s32.totalorder %s1008_s11, %s753_s6  ;;  %p756_p13 = scmp.lt.s32.totalorder %s754_s7, %s748_s22 }
  0x5e   : > { %p751_p6 = pneg %p750_p4 }
  0x5f   : > { %592 = vmatmul.mubr.msk.bf16.vlgmr.msra.gmra.mrb[0].mxu0 %vm227_vm1, %v203_v6  ;;  %p757_p3 = por %p756_p13, %p755_p8 }
  0x60   : > { %615 = vmatprep.mubr.msk.bf16.mxu0 %vm825_vm0, %v824_v0  ;;  %600 = vmatpush3.bf16.msra.mxu1 %v684_v7 }
  0x61   : > { %601 = vmatprep.subr.bf16.mxu1 %v824_v0  ;;  %608 = vmatpush3.bf16.msra.mxu0 %v686_v9  ;;  %p758_p7 = pnand %p757_p3, %p751_p6 }
  0x62   : > { %609 = vmatprep.subr.bf16.mxu0 %v824_v0 }
  0x64   : > { %602 = vmatpush3.bf16.msra.mxu1 %v685_v8 }
  0x65   : > { %610 = vmatpush3.bf16.msra.mxu0 %v687_v10 }
  0x66   : > { %611 = vmatprep.subr.bf16.mxu0 %v824_v0 }
  0x69   : > { %612 = vmatpush3.bf16.msra.mxu0 %v688_v19 }
  0x6a   : > { %613 = vmatprep.subr.bf16.mxu0 %v824_v0 }
  0x6d   : > { %614 = vmatpush3.bf16.msra.mxu0 %v689_v20 }
 0x132   : > { %v265_v12 = vpop.f32.mrb[0].mxu0 }
 0x133   : > { %v266_v13 = vadd.f32 %v552_v11, %v265_v12  ;;  %v593_v14 = vpop.f32.mrb[1].mxu0 }
 0x134   : > { %v268_v15 = vpop.f32.mrb[2].mxu0 }
 0x135   : > { %v271_v16 = vmax.f32 %v266_v13, 0.0  ;;  %v594_v17 = vpop.f32.mrb[3].mxu0 }
 0x137   : > { %v272_v18 = vpack.c.bf16 %v271_v16, %v271_v16 }
 0x139   : > { %604 = vmatmul.mubr.msk.bf16.vlgmr.msra.gmra.mrb[0].mxu1 %vm314_vm2, %v272_v18 }
 0x20c   : > { %v352_v22 = vpop.f32.mrb[0].mxu1 }
 0x20d   : > { %v353_v23 = vadd.f32 %v557_v21, %v352_v22  ;;  %v605_v24 = vpop.f32.mrb[1].mxu1 }
 0x20e   : > { %v355_v25 = vpop.f32.mrb[2].mxu1 }
 0x20f   : > { %v358_v26 = vmax.f32 %v353_v23, 0.0  ;;  %v606_v27 = vpop.f32.mrb[3].mxu1 }
 0x211   : > { %v359_v28 = vadd.f32 %v358_v26, %v271_v16 }
 0x213   : > { %v360_v29 = vpack.c.bf16 %v359_v28, %v359_v28 }
 0x215   : > { %616 = vmatmul.mubr.msk.bf16.vlgmr.msra.gmra.mrb[4].mxu0 %vm314_vm2, %v360_v29 }
 0x2e8   : > { %v439_v31 = vpop.f32.mrb[4].mxu0 }
 0x2e9   : > { %v440_v32 = vadd.f32 %v564_v30, %v439_v31  ;;  %v617_v33 = vpop.f32.mrb[5].mxu0 }
 0x2ea   : > { %v442_v34 = vpop.f32.mrb[6].mxu0 }
 0x2eb   : > { %v445_v35 = vmax.f32 %v440_v32, 0.0  ;;  %v618_v36 = vpop.f32.mrb[7].mxu0 }
 0x2ed   : > { %v446_v37 = vpack.c.bf16 %v445_v35, %v445_v35 }
 0x2ef   : > { %447 = vst [vmem:[%s200_s10] sm:$0xf] %v446_v37 }
 0x2f0   : > { %761 = shalt.err (!%p758_p7)
}
 0x2f1   : > { %s762_s30 = scalar_lea.hbm %s1006_s29, 64  ;;  %s766_s4 = scalar_lea.hbm %s1052_s3, 192 }
 0x2f2   : > { %p763_p9 = scmp.ne.s32.totalorder %s1006_s29, %s762_s30  ;;  %p767_p0 = scmp.lt.u32.totalorder %s1006_s29, %s1052_s3 }
 0x2f3   : > { %p768_p2 = scmp.lt.u32.totalorder %s766_s4, %s762_s30  ;;  %p770_p1 = scmp.lt.u32.totalorder %s762_s30, %s1006_s29 }
 0x2f4   : > { %p764_p11 = pnand %p763_p9, %p930_p12 }
 0x2f5   : > { %p769_p10 = por %p768_p2, %p767_p0 }
 0x2f6   : > { %p765_p5 = pneg %p764_p11 }
 0x2f7   : > { %p771_p4 = por %p770_p1, %p769_p10 }
 0x2f9   : > { %p772_p6 = pnand %p771_p4, %p765_p5 }
 0x2fb   : > { %775 = shalt.err (!%p772_p6)
}
 0x2fc   : > { %625 = dma.vmem_to_hbm [thread:$0]  (%p930_p12), %s1008_s11, 64, %s1006_s29, %s449_s23  }
 0x2fd PF: > { %p642_p8 = scmp.ge.s32.totalorder %s818_s15, 2  ;;  %s474_s5 = sand.u32 1, %s806_s12  }
 0x2fe   : > { %p1067_p13 = scmp.ne.s32.totalorder %s1057_s19, 0  ;;  %s475_s8 = scalar_lea.sflag [#allocation4], %s474_s5 }
 0x300   : > { %p636_p3 = pnand %p642_p8, %p1067_p13 }
 0x302   : > { %801 = dma.done.wait (!%p636_p3), %s475_s8, 64  }
 0x303   : > { %803 = vsyncadd (!%p636_p3), %s475_s8, 4294967232  ;;  %p17_p7 = scmp.ge.s32.totalorder %s900_s24, 5   ;;  %s1068_s12 = smov %s810_s13 }
 0x304   : > { %s1069_s13 = smov %s814_s14  ;;  %s1070_s14 = smov %s926_s17 }
 0x305   : > { %s1071_s15 = smov %s900_s24  ;;  %19 = sbr.rel (!%p17_p7) target bundleno = 6 (0x6), region = 85 }
 0x30c   :  { %480 = vsyncpa [#allocation3], 1 }
 0x30d   :  { %482 = vsyncpa [#allocation3 + $0x1], 1 }
 0x30e   :  { %483 = vsyncpa [#allocation6], 1 }
 0x30f   :  { %484 = vsyncpa [#allocation4], 1 }
 0x310   :  { %486 = vsyncpa [#allocation4 + $0x1], 1 }

</bundles_post_ra>
